<compile_context>
chip_gen: v7x
topology: tpu7x:2x2x1
jax: 0.10.0
libtpu: 0.0.40
codegen_flags: <defaults>
</compile_context>

<pallas_src>
import functools
import math

import jax
import jax.numpy as jnp
from jax.experimental import pallas as pl
from jax.experimental.pallas import tpu as pltpu


def _round_up(n: int, m: int) -> int:
    return -(-n // m) * m


def _interp_matrix(out_size: int, in_size: int) -> jnp.ndarray:
    """Bilinear (half-pixel / OpenCV INTER_LINEAR) interpolation matrix (out_size, in_size)."""
    dst = jnp.arange(out_size, dtype=jnp.float32)
    src = (dst + 0.5) * (in_size / out_size) - 0.5
    src = jnp.clip(src, 0.0, float(in_size - 1))
    i0 = jnp.clip(jnp.floor(src).astype(jnp.int32), 0, in_size - 1)
    i1 = jnp.minimum(i0 + 1, in_size - 1)
    frac = src - i0.astype(jnp.float32)
    m = (jax.nn.one_hot(i0, in_size, dtype=jnp.float32) * (1.0 - frac)[:, None]
         + jax.nn.one_hot(i1, in_size, dtype=jnp.float32) * frac[:, None])
    return m


def _vmem_capacity_bytes() -> int:
    """Per-core VMEM capacity; generation-aware when get_tpu_info is available."""
    try:
        return int(pltpu.get_tpu_info().vmem_capacity_bytes)
    except Exception:
        return 64 * 1024 * 1024  # v7x per-TC capacity: safe lower bound on all gens


def _tile_bytes(shape, dtype) -> int:
    """VMEM footprint of one block, accounting for (8,128) native-tile padding."""
    s = list(shape)
    s[-1] = _round_up(s[-1], 128)
    if len(s) >= 2:
        s[-2] = _round_up(s[-2], 8)
    return math.prod(s) * jnp.dtype(dtype).itemsize


def _maybe_lane_pad(n: int, max_rel_overhead: float = 0.25) -> int:
    """Pad n to a multiple of 128 (lane-dense loads/stores) unless the extra
    HBM traffic would exceed `max_rel_overhead` (the resize is HBM-bound, so
    padding a 16-wide map to 128 would cost more than masked accesses save)."""
    p = _round_up(n, 128)
    return p if (p - n) <= max_rel_overhead * n else n


def _make_resize_kernel(c_blk: int, out_dtype):
    out_is_int = jnp.issubdtype(jnp.dtype(out_dtype), jnp.integer)

    def kernel(wh_ref, ww_ref, x_ref, o_ref):
        # wh_ref: (h_band, H)           row-interp weights, shared by all channels
        # ww_ref: (w_in_p, w_out_p)     col-interp weights, shared, constant over grid
        # x_ref : (1, c_blk, H, w_in_p)         one channel group, full input rows
        # o_ref : (1, c_blk, h_band, w_out_p)   one channel group, one H_out band
        wh = wh_ref[...]
        ww = ww_ref[...]
        for c in range(c_blk):                 # small & static; unrolled at trace time
            xc = x_ref[0, c].astype(wh.dtype)  # integer images are cast once here
            t = jnp.dot(wh, xc, preferred_element_type=jnp.float32)      # (band, W)
            t = t.astype(ww.dtype)             # keep bf16 operands bf16 (f32: no-op)
            out = jnp.dot(t, ww, preferred_element_type=jnp.float32)     # (band, W_out)
            if out_is_int:
                info = jnp.iinfo(out_dtype)
                # NOTE: cv::resize-style saturation.  For int32 outputs info.max is
                # not exactly representable in f32; harmless for image data.
                out = jnp.clip(jnp.round(out), float(info.min), float(info.max))
            o_ref[0, c] = out.astype(o_ref.dtype)

    return kernel


@functools.partial(jax.jit, static_argnames=("h_out", "w_out", "bf16_weights"))
def _resize_chw(x_chw, *, h_out: int, w_out: int, bf16_weights: bool = False):
    C, H, W = x_chw.shape
    x_dtype = x_chw.dtype

    # MXU operand dtype: bf16 images stay bf16 (f32 accumulation); f32/int images
    # use f32 weights unless bf16_weights is requested (halves weight VMEM/DMA and
    # runs the MXU at full rate on v5e/v6e, at ~3 decimal digits of weight precision).
    if x_dtype == jnp.bfloat16 or bf16_weights:
        compute_dtype = jnp.bfloat16
    else:
        compute_dtype = jnp.float32

    # ---- lane padding of per-channel widths (only when cheap; see helper) ----
    w_in_p = _maybe_lane_pad(W)
    w_out_p = _maybe_lane_pad(w_out)

    # ---- H_out band tiling: second grid axis bounds per-step VMEM (v7x) ----
    h8 = _round_up(h_out, 8)
    n_bands = max(1, -(-h8 // 512))            # target <= ~512 output rows per band
    h_band = _round_up(-(-h8 // n_bands), 8)
    h_out_pad = n_bands * h_band

    # ---- shared interpolation matrices (padding rows/cols are exact zeros) ----
    wh = _interp_matrix(h_out, H)                                        # (h_out, H)
    wh = jnp.pad(wh, ((0, h_out_pad - h_out), (0, 0))).astype(compute_dtype)
    ww = _interp_matrix(w_out, W).T                                      # (W, w_out)
    ww = jnp.pad(ww, ((0, w_in_p - W), (0, w_out_p - w_out))).astype(compute_dtype)

    # ---- channel grouping: derive c_blk from the actual per-step VMEM bytes ----
    vmem_cap = _vmem_capacity_bytes()
    budget = int(vmem_cap * 0.7)

    def step_bytes(cb: int) -> int:
        b = 2 * _tile_bytes((h_band, H), compute_dtype)            # wh (double-buffered)
        b += 2 * _tile_bytes((w_in_p, w_out_p), compute_dtype)     # ww (double-buffered)
        b += 2 * _tile_bytes((cb, H, w_in_p), x_dtype)             # x block
        b += 2 * _tile_bytes((cb, h_band, w_out_p), x_dtype)       # out block
        b += 3 * _tile_bytes((h_band, max(w_in_p, w_out_p)), jnp.float32)  # temporaries
        return b

    if C <= 1:
        c_blk = 1
    else:
        cap_blk = min(8, -(-C // 2))     # keep >= 2 grid steps so both v7x TCs get work
        c_blk = 1
        for cand in range(cap_blk, 0, -1):
            if step_bytes(cand) <= budget:
                c_blk = cand
                break
    g = -(-C // c_blk)
    c_pad = g * c_blk

    vmem_limit = int(min(vmem_cap, max(2 * step_bytes(c_blk), 32 * 1024 * 1024)))

    # ---- input padding; the reshape to (g, c_blk, H, w_in_p) is a free view ----
    pad_c = c_pad - C
    pad_w = w_in_p - W
    if pad_c or pad_w:
        x_chw = jnp.pad(x_chw, ((0, pad_c), (0, 0), (0, pad_w)))
    x_b = x_chw.reshape(g, c_blk, H, w_in_p)

    kernel = _make_resize_kernel(c_blk, x_dtype)

    out_b = pl.pallas_call(
        kernel,
        out_shape=jax.ShapeDtypeStruct((g, c_blk, h_out_pad, w_out_p), x_dtype),
        grid_spec=pltpu.PrefetchScalarGridSpec(
            num_scalar_prefetch=0,
            # channel groups (outer) x H_out bands (inner): x's block index is
            # constant over the inner axis, so its re-DMA is elided.
            grid=(g, n_bands),
            in_specs=[
                pl.BlockSpec((h_band, H), lambda i, j: (j, 0)),
                pl.BlockSpec((w_in_p, w_out_p), lambda i, j: (0, 0)),
                pl.BlockSpec((1, c_blk, H, w_in_p), lambda i, j: (i, 0, 0, 0)),
            ],
            out_specs=pl.BlockSpec((1, c_blk, h_band, w_out_p),
                                   lambda i, j: (i, 0, j, 0)),
        ),
        compiler_params=pltpu.CompilerParams(
            dimension_semantics=("parallel", "parallel"),
            vmem_limit_bytes=vmem_limit,
        ),
    )(wh, ww, x_b)

    # Unfold channels (free view, no transpose) and drop channel/row/lane padding.
    out = out_b.reshape(c_pad, h_out_pad, w_out_p)
    return out[:C, :h_out, :w_out]


def resize_forward(x, params, indicies=None, *, bf16_weights=False):
    """Pallas equivalent of Resize.forward.

    x: (1, C, H, W) array.  params: (scale_h, scale_w) python floats.
    indicies: unused (matches the PyTorch module, which ignores it).
    Returns (1, C, round(H*scale_h), round(W*scale_w)) with x.dtype.
    """
    if not isinstance(params[0], float) or not isinstance(params[1], float):
        # Mirrors the PyTorch module, which only warns and continues.
        print('Resize must have two parameters, which should be positive floats.')
    del indicies  # unused, same as the reference module
    scale_h, scale_w = float(params[0]), float(params[1])
    N, C, H, W = x.shape
    assert N == 1, "Resize module semantics (squeeze/unsqueeze) assume batch == 1"
    # NOTE: OpenCV-style output size (rounded); F.interpolate(scale_factor=...) floors.
    h_out = int(round(H * scale_h))
    w_out = int(round(W * scale_w))
    out_chw = _resize_chw(x[0], h_out=h_out, w_out=w_out, bf16_weights=bf16_weights)
    return out_chw[None, ...]


if __name__ == "__main__":
    key = jax.random.PRNGKey(0)
    x = jax.random.normal(key, (1, 8, 16, 16), dtype=jnp.float32)
    params = (2.0, 1.5)          # scale H by 2.0, W by 1.5
    indicies = None              # unused by forward

    out = resize_forward(x, params, indicies)
    out = jax.block_until_ready(out)
    assert out.shape == (1, 8, 32, 24), out.shape
    assert out.dtype == x.dtype

    # f32 path: matches JAX's bilinear resize (same half-pixel convention).
    ref = jax.image.resize(x, (1, 8, 32, 24), method="linear")
    assert jnp.allclose(out, ref, atol=1e-4, rtol=1e-4)

    # Odd channel count exercises the channel-group padding / slicing path.
    x3 = x[:, :3]
    out3 = jax.block_until_ready(resize_forward(x3, params, indicies))
    ref3 = jax.image.resize(x3, (1, 3, 32, 24), method="linear")
    assert out3.shape == (1, 3, 32, 24)
    assert jnp.allclose(out3, ref3, atol=1e-4, rtol=1e-4)

    # bf16 path (bf16 MXU operands, f32 accumulation) — loose tolerance since
    # bf16 interpolation weights carry only ~3 decimal digits.
    xb = x.astype(jnp.bfloat16)
    outb = jax.block_until_ready(resize_forward(xb, params, indicies))
    assert outb.shape == (1, 8, 32, 24) and outb.dtype == jnp.bfloat16
    assert jnp.allclose(outb.astype(jnp.float32), ref, atol=0.1, rtol=0.1)

    print("KERNEL_OK")
</pallas_src>

<mosaic_0001>
module attributes {stable_mosaic.version = 11 : i64} {
  func.func @kernel(%arg0: i32, %arg1: i32, %arg2: memref<32x16xf32, #tpu.memory_space<vmem>>, %arg3: memref<16x24xf32, #tpu.memory_space<vmem>>, %arg4: memref<1x4x16x16xf32, #tpu.memory_space<vmem>>, %arg5: memref<1x4x32x24xf32, #tpu.memory_space<vmem>>) attributes {dimension_semantics = [#tpu.dimension_semantics<parallel>, #tpu.dimension_semantics<parallel>], iteration_bounds = array<i64: 2, 1>, scalar_prefetch = 0 : i64, scratch_operands = 0 : i64, tpu.core_type = #tpu.core_type<tc>, window_params = [{transform_indices = @transform_0, window_bounds = array<i64: 32, 16>}, {pipeline_mode = #tpu.pipeline_mode<synchronous>, transform_indices = @transform_1, window_bounds = array<i64: 16, 24>}, {transform_indices = @transform_2, window_bounds = array<i64: 1, 4, 16, 16>}, {transform_indices = @transform_3, window_bounds = array<i64: 1, 4, 32, 24>}]} {
    %c0 = arith.constant 0 : index
    %c0_0 = arith.constant 0 : index
    %0 = vector.load %arg2[%c0, %c0_0] : memref<32x16xf32, #tpu.memory_space<vmem>>, vector<32x16xf32>
    %c0_1 = arith.constant 0 : index
    %c0_2 = arith.constant 0 : index
    %1 = vector.load %arg3[%c0_1, %c0_2] : memref<16x24xf32, #tpu.memory_space<vmem>>, vector<16x24xf32>
    %c0_3 = arith.constant 0 : index
    %c0_4 = arith.constant 0 : index
    %c0_5 = arith.constant 0 : index
    %c0_6 = arith.constant 0 : index
    %2 = vector.load %arg4[%c0_3, %c0_4, %c0_5, %c0_6] : memref<1x4x16x16xf32, #tpu.memory_space<vmem>>, vector<1x1x16x16xf32>
    %3 = vector.shape_cast %2 : vector<1x1x16x16xf32> to vector<16x16xf32>
    %cst = arith.constant dense<0.000000e+00> : vector<32x16xf32>
    %4 = tpu.matmul %0, %3, %cst {dimension_numbers = #tpu.dot_dimension_numbers<[1], [0], [0], [1], [0, 0, 1, 1], [], []>} : vector<32x16xf32>, vector<16x16xf32>, vector<32x16xf32> -> vector<32x16xf32>
    %cst_7 = arith.constant dense<0.000000e+00> : vector<32x24xf32>
    %5 = tpu.matmul %4, %1, %cst_7 {dimension_numbers = #tpu.dot_dimension_numbers<[1], [0], [0], [1], [0, 0, 1, 1], [], []>} : vector<32x16xf32>, vector<16x24xf32>, vector<32x24xf32> -> vector<32x24xf32>
    %c0_8 = arith.constant 0 : index
    %c0_9 = arith.constant 0 : index
    %c0_10 = arith.constant 0 : index
    %c0_11 = arith.constant 0 : index
    %6 = vector.load %arg5[%c0_8, %c0_9, %c0_10, %c0_11] : memref<1x4x32x24xf32, #tpu.memory_space<vmem>>, vector<1x1x32x24xf32>
    %7 = vector.shape_cast %6 : vector<1x1x32x24xf32> to vector<32x24xf32>
    %8 = vector.shape_cast %5 : vector<32x24xf32> to vector<1x1x32x24xf32>
    tpu.vector_store %arg5[%c0_8, %c0_9, %c0_10, %c0_11], %8 {strides = array<i32>} : memref<1x4x32x24xf32, #tpu.memory_space<vmem>>, vector<1x1x32x24xf32>,
    %c0_12 = arith.constant 0 : index
    %c1 = arith.constant 1 : index
    %c0_13 = arith.constant 0 : index
    %c0_14 = arith.constant 0 : index
    %9 = vector.load %arg4[%c0_12, %c1, %c0_13, %c0_14] : memref<1x4x16x16xf32, #tpu.memory_space<vmem>>, vector<1x1x16x16xf32>
    %10 = vector.shape_cast %9 : vector<1x1x16x16xf32> to vector<16x16xf32>
    %cst_15 = arith.constant dense<0.000000e+00> : vector<32x16xf32>
    %11 = tpu.matmul %0, %10, %cst_15 {dimension_numbers = #tpu.dot_dimension_numbers<[1], [0], [0], [1], [0, 0, 1, 1], [], []>} : vector<32x16xf32>, vector<16x16xf32>, vector<32x16xf32> -> vector<32x16xf32>
    %cst_16 = arith.constant dense<0.000000e+00> : vector<32x24xf32>
    %12 = tpu.matmul %11, %1, %cst_16 {dimension_numbers = #tpu.dot_dimension_numbers<[1], [0], [0], [1], [0, 0, 1, 1], [], []>} : vector<32x16xf32>, vector<16x24xf32>, vector<32x24xf32> -> vector<32x24xf32>
    %c0_17 = arith.constant 0 : index
    %c1_18 = arith.constant 1 : index
    %c0_19 = arith.constant 0 : index
    %c0_20 = arith.constant 0 : index
    %13 = vector.load %arg5[%c0_17, %c1_18, %c0_19, %c0_20] : memref<1x4x32x24xf32, #tpu.memory_space<vmem>>, vector<1x1x32x24xf32>
    %14 = vector.shape_cast %13 : vector<1x1x32x24xf32> to vector<32x24xf32>
    %15 = vector.shape_cast %12 : vector<32x24xf32> to vector<1x1x32x24xf32>
    tpu.vector_store %arg5[%c0_17, %c1_18, %c0_19, %c0_20], %15 {strides = array<i32>} : memref<1x4x32x24xf32, #tpu.memory_space<vmem>>, vector<1x1x32x24xf32>,
    %c0_21 = arith.constant 0 : index
    %c2 = arith.constant 2 : index
    %c0_22 = arith.constant 0 : index
    %c0_23 = arith.constant 0 : index
    %16 = vector.load %arg4[%c0_21, %c2, %c0_22, %c0_23] : memref<1x4x16x16xf32, #tpu.memory_space<vmem>>, vector<1x1x16x16xf32>
    %17 = vector.shape_cast %16 : vector<1x1x16x16xf32> to vector<16x16xf32>
    %cst_24 = arith.constant dense<0.000000e+00> : vector<32x16xf32>
    %18 = tpu.matmul %0, %17, %cst_24 {dimension_numbers = #tpu.dot_dimension_numbers<[1], [0], [0], [1], [0, 0, 1, 1], [], []>} : vector<32x16xf32>, vector<16x16xf32>, vector<32x16xf32> -> vector<32x16xf32>
    %cst_25 = arith.constant dense<0.000000e+00> : vector<32x24xf32>
    %19 = tpu.matmul %18, %1, %cst_25 {dimension_numbers = #tpu.dot_dimension_numbers<[1], [0], [0], [1], [0, 0, 1, 1], [], []>} : vector<32x16xf32>, vector<16x24xf32>, vector<32x24xf32> -> vector<32x24xf32>
    %c0_26 = arith.constant 0 : index
    %c2_27 = arith.constant 2 : index
    %c0_28 = arith.constant 0 : index
    %c0_29 = arith.constant 0 : index
    %20 = vector.load %arg5[%c0_26, %c2_27, %c0_28, %c0_29] : memref<1x4x32x24xf32, #tpu.memory_space<vmem>>, vector<1x1x32x24xf32>
    %21 = vector.shape_cast %20 : vector<1x1x32x24xf32> to vector<32x24xf32>
    %22 = vector.shape_cast %19 : vector<32x24xf32> to vector<1x1x32x24xf32>
    tpu.vector_store %arg5[%c0_26, %c2_27, %c0_28, %c0_29], %22 {strides = array<i32>} : memref<1x4x32x24xf32, #tpu.memory_space<vmem>>, vector<1x1x32x24xf32>,
    %c0_30 = arith.constant 0 : index
    %c3 = arith.constant 3 : index
    %c0_31 = arith.constant 0 : index
    %c0_32 = arith.constant 0 : index
    %23 = vector.load %arg4[%c0_30, %c3, %c0_31, %c0_32] : memref<1x4x16x16xf32, #tpu.memory_space<vmem>>, vector<1x1x16x16xf32>
    %24 = vector.shape_cast %23 : vector<1x1x16x16xf32> to vector<16x16xf32>
    %cst_33 = arith.constant dense<0.000000e+00> : vector<32x16xf32>
    %25 = tpu.matmul %0, %24, %cst_33 {dimension_numbers = #tpu.dot_dimension_numbers<[1], [0], [0], [1], [0, 0, 1, 1], [], []>} : vector<32x16xf32>, vector<16x16xf32>, vector<32x16xf32> -> vector<32x16xf32>
    %cst_34 = arith.constant dense<0.000000e+00> : vector<32x24xf32>
    %26 = tpu.matmul %25, %1, %cst_34 {dimension_numbers = #tpu.dot_dimension_numbers<[1], [0], [0], [1], [0, 0, 1, 1], [], []>} : vector<32x16xf32>, vector<16x24xf32>, vector<32x24xf32> -> vector<32x24xf32>
    %c0_35 = arith.constant 0 : index
    %c3_36 = arith.constant 3 : index
    %c0_37 = arith.constant 0 : index
    %c0_38 = arith.constant 0 : index
    %27 = vector.load %arg5[%c0_35, %c3_36, %c0_37, %c0_38] : memref<1x4x32x24xf32, #tpu.memory_space<vmem>>, vector<1x1x32x24xf32>
    %28 = vector.shape_cast %27 : vector<1x1x32x24xf32> to vector<32x24xf32>
    %29 = vector.shape_cast %26 : vector<32x24xf32> to vector<1x1x32x24xf32>
    tpu.vector_store %arg5[%c0_35, %c3_36, %c0_37, %c0_38], %29 {strides = array<i32>} : memref<1x4x32x24xf32, #tpu.memory_space<vmem>>, vector<1x1x32x24xf32>,
    return
  }
  func.func @transform_0(%arg0: i32, %arg1: i32) -> (i32, i32) {
    %c0_i32 = arith.constant 0 : i32
    %c0_i32_0 = arith.constant 0 : i32
    return %arg1, %c0_i32 : i32, i32
  }
  func.func @transform_1(%arg0: i32, %arg1: i32) -> (i32, i32) {
    %c0_i32 = arith.constant 0 : i32
    %c0_i32_0 = arith.constant 0 : i32
    %c0_i32_1 = arith.constant 0 : i32
    return %c0_i32, %c0_i32_0 : i32, i32
  }
  func.func @transform_2(%arg0: i32, %arg1: i32) -> (i32, i32, i32, i32) {
    %c0_i32 = arith.constant 0 : i32
    %c0_i32_0 = arith.constant 0 : i32
    %c0_i32_1 = arith.constant 0 : i32
    %c0_i32_2 = arith.constant 0 : i32
    return %arg0, %c0_i32, %c0_i32_0, %c0_i32_1 : i32, i32, i32, i32
  }
  func.func @transform_3(%arg0: i32, %arg1: i32) -> (i32, i32, i32, i32) {
    %c0_i32 = arith.constant 0 : i32
    %c0_i32_0 = arith.constant 0 : i32
    %c0_i32_1 = arith.constant 0 : i32
    return %arg0, %c0_i32, %arg1, %c0_i32_0 : i32, i32, i32, i32
  }
}

</mosaic_0001>

<bundles_post_ra>
// kernel: _resize_chw.1
= control target key start
LH: loop header
LB: loop body
LE: loop exit
PB: predicated region body
PF: predicated region fallthrough
CT: control target
= control target key end

     0   :  { %8 = vsyncpa [#allocation3], 0  ;;  %s1727_s0 = inlined_call_operand.vmem [shape: f32[32,16], index: 0, kind: input, shape index: {}]   ;;  %s1728_s1 = inlined_call_operand.vmem [shape: f32[16,24], index: 1, kind: input, shape index: {}]   ;;  %s1729_s2 = inlined_call_operand.hbm [shape: f32[2,4,16,16], index: 2, kind: input, shape index: {}]   ;;  %s1730_s3 = inlined_call_operand.vmem [shape: f32[2,4,32,24], index: 3, kind: output, shape index: {}]  }
   0x1   :  { %10 = vsyncpa [#allocation3 + $0x1], 0  ;;  %s1509_s12 = smov 0   ;;  %s1511_s13 = smov 0  }
   0x2   :  { %s1513_s14 = smov 0   ;;  %s1515_s15 = smov 0  }
   0x3   :  { %s1517_s16 = smov 0   ;;  %s1519_s17 = smov 0  }
   0x4 LB: > { %s1121_s18 = sadd.s32 4294967295, %s1484_s17   ;;  %s28_s19 = sadd.s32 1, %s1480_s16  ;;  %s1484_s17 = sphi %s1519_s17, %s16_s17   ;;  %s1480_s16 = sphi %s1517_s16, %s1738_s16   ;;  %s1476_s15 = sphi %s1515_s15, %s1737_s15   ;;  %s1472_s14 = sphi %s1513_s14, %s1736_s14   ;;  %s1468_s13 = sphi %s1511_s13, %s1735_s13   ;;  %s1464_s12 = sphi %s1509_s12, %s1734_s12  }
   0x5   : > { %p30_p0 = scmp.ge.s32.totalorder %s28_s19, 2  ;;  %s82_s20 = sadd.s32 1, %s1472_s14 }
   0x6   : > { %p89_p1 = scmp.ne.s32.totalorder %s1472_s14, %s1468_s13  ;;  %p90_p2 = scmp.eq.s32.totalorder %s1484_s17, 0 }
   0x7   : > { %s1740_s19 = smov (%p30_p0, %s28_s19), 0  ;;  %p95_p4 = scmp.ne.s32.totalorder %s1468_s13, %s1464_s12 }
   0x8   : > { %p1545_p3 = por %p90_p2, %p89_p1  ;;  %s79_s22 = ssub.s32 %s1480_s16, %s1740_s19 }
   0x9   : > { %p96_p5 = scmp.eq.s32.totalorder %s1121_s18, 0  ;;  %p80_p6 = scmp.eq.s32.totalorder %s79_s22, 0 }
   0xa   : > { %p1353_p8 = scmp.lt.s32.totalorder %s1484_s17, 2  ;;  %s159_s25 = sand.u32 1, %s1472_s14  }
   0xb   : > { %p1552_p7 = por %p96_p5, %p95_p4  ;;  %s1185_s26 = sshll.u32 %s1480_s16, 10 }
   0xc   : > { %s1558_s24 = scalar_select %p80_p6, %s1472_s14, %s82_s20  }
   0xd   : > { %s1126_s27 = sshll.u32 %s159_s25, 6  ;;  %s1565_s30 = scalar_lea.hbm %s1729_s2, %s1185_s26 }
   0xe   : > { %s163_s4 = scalar_lea.vmem [#allocation2], %s1126_s27  ;;  %p1569_p9 = pnand %p1353_p8, %p1545_p3 }
   0xf   : > { %s170_s5 = sshll.u32 %s163_s4, 4  ;;  %s1575_s7 = scalar_lea.sflag [#allocation3], %s159_s25  ;;  %s1573_s5 = int_to_ptr.vmem [resolvable:$true] %s170_s5 }
  0x10   : > { %s1404_s8 = scalar_lea.hbm %s1565_s30, 1024  ;;  %p1406_p11 = pneg %p1569_p9 }
  0x11   : > { %p1405_p10 = scmp.ne.s32.totalorder %s1565_s30, %s1404_s8  ;;  %s1409_s11 = scalar_lea.hbm %s1729_s2, 2048 }
  0x12   : > { %p1410_p0 = scmp.lt.u32.totalorder %s1565_s30, %s1729_s2  ;;  %p1411_p1 = scmp.lt.u32.totalorder %s1409_s11, %s1404_s8 }
  0x13   : > { %p1407_p12 = pnand %p1406_p11, %p1405_p10  ;;  %p1413_p3 = scmp.lt.u32.totalorder %s1404_s8, %s1565_s30 }
  0x14   : > { %p1412_p2 = por %p1411_p1, %p1410_p0 }
  0x15   : > { %p1408_p13 = pneg %p1407_p12 }
  0x16   : > { %p1414_p4 = por %p1413_p3, %p1412_p2 }
  0x18   : > { %p1415_p5 = pnand %p1414_p4, %p1408_p13 }
  0x1a   : > { %1418 = shalt.err (!%p1415_p5)
}
  0x1b   : > { %s1419_s20 = scalar_lea.vmem %s1573_s5, 1024  ;;  %s1486_s21 = smov [#allocation2]  }
  0x1c   : > { %p1420_p6 = scmp.ne.s32.totalorder %s1573_s5, %s1419_s20  ;;  %s1424_s22 = sshll.u32 %s1486_s21, 4  ;;  %s1425_s22 = int_to_ptr.vmem [resolvable:$false] %s1424_s22 }
  0x1d   : > { %s1426_s25 = scalar_lea.vmem %s1425_s22, 2048  ;;  %p1427_p12 = scmp.lt.s32.totalorder %s1573_s5, %s1425_s22 }
  0x1e   : > { %p1422_p8 = pnand %p1420_p6, %p1406_p11  ;;  %p1428_p0 = scmp.lt.s32.totalorder %s1426_s25, %s1419_s20 }
  0x20   : > { %p1423_p10 = pneg %p1422_p8  ;;  %p1429_p1 = por %p1428_p0, %p1427_p12 }
  0x22   : > { %p1430_p2 = pnand %p1429_p1, %p1423_p10 }
  0x24   : > { %1433 = shalt.err (!%p1430_p2)
}
  0x25   : > { %s1487_s26 = smov 128   ;;  %s1488_s27 = smov 8  }
  0x26   : > { %1352 = dma.hbm_to_vmem [thread:$0]  (!%p1569_p9), %s1565_s30, 1024, %s1573_s5, %s1575_s7, %s1487_s26, %s1487_s26, %s1488_s27  }
  0x27   : > { %p1129_p11 = scmp.ge.s32.totalorder %s1484_s17, 1  ;;  %p178_p13 = scmp.lt.s32.totalorder %s1484_s17, 3 }
  0x29   : > { %p179_p3 = pnand %p1129_p11, %p178_p13 }
  0x2a   : > { %s184_s28 = sand.u32 (!%p179_p3), 1, %s1468_s13  }
  0x2b   : > { %182 = sbr.rel (%p179_p3) target bundleno = 514 (0x202), region = 32  ;;  %s1130_s29 = sshll.u32 (!%p179_p3), %s184_s28, 6 }
  0x2c   : > { %s185_s4 = scalar_lea.sflag (!%p179_p3), [#allocation3], %s184_s28  ;;  %s1606_s8 = scalar_lea.vmem (!%p179_p3), [#allocation2], %s1130_s29 }
  0x32   : > { %1459 = dma.done.wait (%p1552_p7), %s185_s4, 1024  }
  0x33   : > { %1461 = vsyncadd (%p1552_p7), %s185_s4, 4294966272  ;;  %vm244_vm0 = vcmask 130048   ;;  %v242_v0 = vld [vmem:[%s1606_s8] sm:$0xff]  ;;  %v243_v1 = vld [vmem:[%s1606_s8 + $0x8] sm:$0xff]  ;;  %p227_p7 = scmp.lt.s32.totalorder %s1476_s15, 1  ;;  %vm439_vm1 = vcmask 195584  }
  0x34   : > { %v236_v2 = vld [vmem:[%s1727_s0] sm:$0xff]  ;;  %v1315_v3 = vpack.c.bf16 %v243_v1, %v242_v0  ;;  %v1141_v4 = vld [vmem:[%s1606_s8 + $0x10] sm:$0xff]  ;;  %v1142_v5 = vld [vmem:[%s1606_s8 + $0x18] sm:$0xff] }
  0x35   : > { %1239 = vmatprep.mubr.msk.f32.mxu0 %vm244_vm0, %v236_v2  ;;  %v1323_v6 = vpack.c.bf16 %v1142_v5, %v1141_v4  ;;  %v1155_v7 = vld [vmem:[%s1606_s8 + $0x20] sm:$0xff]  ;;  %v1156_v8 = vld [vmem:[%s1606_s8 + $0x28] sm:$0xff]  ;;  %v238_v12 = vld [vmem:[%s1727_s0 + $0x10] sm:$0xff]  ;;  %s1742_s15 = smov (!%p227_p7, %s1476_s15), 1 }
  0x36   : > { %1316 = vmatprep.subr.bf16.mxu0 %v1315_v3  ;;  %v237_v9 = vld [vmem:[%s1727_s0 + $0x8] sm:$0xff]  ;;  %v240_v10 = vld [vmem:[%s1728_s1] sm:$0xff]  ;;  %v1331_v13 = vpack.c.bf16 %v1156_v8, %v1155_v7  ;;  %v239_v15 = vld [vmem:[%s1727_s0 + $0x18] sm:$0xff]  ;;  %s1186_s22 = sshll.u32 %s1742_s15, 7 }
  0x37   : > { %1318 = vmatpush3.bf16.msra.mxu0 %v1315_v3  ;;  %v241_v11 = vld [vmem:[%s1728_s1 + $0x8] sm:$0xff]  ;;  %v1169_v16 = vld [vmem:[%s1606_s8 + $0x30] sm:$0xff]  ;;  %v1170_v17 = vld [vmem:[%s1606_s8 + $0x38] sm:$0xff]  ;;  %s1675_s27 = scalar_lea.vmem %s1730_s3, %s1186_s22 }
  0x38   : > { %1324 = vmatprep.subr.bf16.mxu0 %v1323_v6  ;;  %v1319_v14 = vpack.c.bf16 %v241_v11, %v240_v10  ;;  %v1339_v18 = vpack.c.bf16 %v1170_v17, %v1169_v16 }
  0x3a   : > { %1240 = vmatmul.mubr.msk.f32.vlgmr.msra.gmra.mrb[0].mxu0 %vm244_vm0, %v237_v9  ;;  %1320 = vmatprep.subr.bf16.mxu1 %v1319_v14 }
  0x3b   : > { %1326 = vmatpush3.bf16.msra.mxu0 %v1323_v6  ;;  %1242 = vmatprep.mubr.msk.f32.mxu0 %vm244_vm0, %v238_v12 }
  0x3c   : > { %1332 = vmatprep.subr.bf16.mxu0 %v1331_v13  ;;  %1322 = vmatpush3.bf16.msra.mxu1 %v1319_v14 }
  0x3d   : > { %1328 = vmatprep.subr.bf16.mxu1 %v1319_v14 }
  0x3e   : > { %1243 = vmatmul.mubr.msk.f32.gmra.mrb[2].mxu0 %vm244_vm0, %v239_v15 }
  0x3f   : > { %1259 = vmatprep.mubr.msk.f32.mxu0 %vm244_vm0, %v236_v2 }
  0x42   : > { %1260 = vmatmul.mubr.msk.f32.vlgmr.msra.gmra.mrb[4].mxu0 %vm244_vm0, %v237_v9 }
  0x43   : > { %1334 = vmatpush3.bf16.msra.mxu0 %v1331_v13  ;;  %1262 = vmatprep.mubr.msk.f32.mxu0 %vm244_vm0, %v238_v12 }
  0x44   : > { %1340 = vmatprep.subr.bf16.mxu0 %v1339_v18 }
  0x46   : > { %1263 = vmatmul.mubr.msk.f32.gmra.mrb[6].mxu0 %vm244_vm0, %v239_v15 }
  0x47   : > { %1279 = vmatprep.mubr.msk.f32.mxu0 %vm244_vm0, %v236_v2 }
  0x4a   : > { %1280 = vmatmul.mubr.msk.f32.vlgmr.msra.gmra.mrb[8].mxu0 %vm244_vm0, %v237_v9 }
  0x4b   : > { %1342 = vmatpush3.bf16.msra.mxu0 %v1339_v18  ;;  %1282 = vmatprep.mubr.msk.f32.mxu0 %vm244_vm0, %v238_v12 }
  0x4e   : > { %1283 = vmatmul.mubr.msk.f32.gmra.mrb[10].mxu0 %vm244_vm0, %v239_v15 }
  0x4f   : > { %1299 = vmatprep.mubr.msk.f32.mxu0 %vm244_vm0, %v236_v2 }
  0x52   : > { %1300 = vmatmul.mubr.msk.f32.vlgmr.msra.gmra.mrb[12].mxu0 %vm244_vm0, %v237_v9 }
  0x53   : > { %1302 = vmatprep.mubr.msk.f32.mxu0 %vm244_vm0, %v238_v12 }
  0x56   : > { %1303 = vmatmul.mubr.msk.f32.gmra.mrb[14].mxu0 %vm244_vm0, %v239_v15 }
 0x10d   : > { %v1241_v19 = vpop.f32.mrb[0].mxu0 }
 0x10e   : > { %v323_v20 = vpop.f32.mrb[1].mxu0 }
 0x10f   : > { %1249 = vmatprep.mubr.msk.f32.mxu1 %vm244_vm0, %v323_v20 }
 0x110   : > { %1250 = vmatmul.mubr.msk.f32.vlgmr.msra.gmra.mrb[0].mxu1 %vm244_vm0, %v1241_v19 }
 0x111   : > { %v1244_v21 = vpop.f32.mrb[2].mxu0  ;;  %1330 = vmatpush3.bf16.msra.mxu1 %v1319_v14 }
 0x112   : > { %v333_v22 = vpop.f32.mrb[3].mxu0  ;;  %1336 = vmatprep.subr.bf16.mxu1 %v1319_v14 }
 0x113   : > { %1252 = vmatprep.mubr.msk.f32.mxu1 %vm244_vm0, %v333_v22 }
 0x114   : > { %1253 = vmatmul.mubr.msk.f32.gmra.mrb[2].mxu1 %vm244_vm0, %v1244_v21 }
 0x115   : > { %v1261_v23 = vpop.f32.mrb[4].mxu0 }
 0x116   : > { %v513_v24 = vpop.f32.mrb[5].mxu0 }
 0x117   : > { %1269 = vmatprep.mubr.msk.f32.mxu1 %vm244_vm0, %v513_v24 }
 0x118   : > { %1270 = vmatmul.mubr.msk.f32.vlgmr.msra.gmra.mrb[4].mxu1 %vm244_vm0, %v1261_v23 }
 0x119   : > { %v1264_v25 = vpop.f32.mrb[6].mxu0  ;;  %1338 = vmatpush3.bf16.msra.mxu1 %v1319_v14 }
 0x11a   : > { %v523_v26 = vpop.f32.mrb[7].mxu0  ;;  %1344 = vmatprep.subr.bf16.mxu1 %v1319_v14 }
 0x11b   : > { %1272 = vmatprep.mubr.msk.f32.mxu1 %vm244_vm0, %v523_v26 }
 0x11c   : > { %1273 = vmatmul.mubr.msk.f32.gmra.mrb[6].mxu1 %vm244_vm0, %v1264_v25 }
 0x11d   : > { %v1281_v27 = vpop.f32.mrb[8].mxu0 }
 0x11e   : > { %v703_v28 = vpop.f32.mrb[9].mxu0 }
 0x11f   : > { %1289 = vmatprep.mubr.msk.f32.mxu1 %vm244_vm0, %v703_v28 }
 0x120   : > { %1290 = vmatmul.mubr.msk.f32.vlgmr.msra.gmra.mrb[8].mxu1 %vm244_vm0, %v1281_v27 }
 0x121   : > { %v1284_v29 = vpop.f32.mrb[10].mxu0  ;;  %1346 = vmatpush3.bf16.msra.mxu1 %v1319_v14 }
 0x122   : > { %v713_v30 = vpop.f32.mrb[11].mxu0 }
 0x123   : > { %1292 = vmatprep.mubr.msk.f32.mxu1 %vm244_vm0, %v713_v30 }
 0x124   : > { %1293 = vmatmul.mubr.msk.f32.gmra.mrb[10].mxu1 %vm244_vm0, %v1284_v29 }
 0x125   : > { %v1301_v31 = vpop.f32.mrb[12].mxu0 }
 0x126   : > { %v893_v32 = vpop.f32.mrb[13].mxu0 }
 0x127   : > { %1309 = vmatprep.mubr.msk.f32.mxu1 %vm244_vm0, %v893_v32 }
 0x128   : > { %1310 = vmatmul.mubr.msk.f32.vlgmr.msra.gmra.mrb[12].mxu1 %vm244_vm0, %v1301_v31 }
 0x129   : > { %v1304_v33 = vpop.f32.mrb[14].mxu0 }
 0x12a   : > { %v903_v34 = vpop.f32.mrb[15].mxu0 }
 0x12b   : > { %1312 = vmatprep.mubr.msk.f32.mxu1 %vm244_vm0, %v903_v34 }
 0x12c   : > { %1313 = vmatmul.mubr.msk.f32.gmra.mrb[14].mxu1 %vm244_vm0, %v1304_v33 }
 0x1e3   : > { %v1251_v35 = vpop.f32.mrb[0].mxu1 }
 0x1e4   : > { %441 = vst.msk [vmem:[%s1675_s27 + $0x8] sm:$0xff] %vm439_vm1, %v1251_v35  ;;  %v420_v36 = vpop.f32.mrb[1].mxu1 }
 0x1e5   : > { %440 = vst.msk [vmem:[%s1675_s27] sm:$0xff] %vm439_vm1, %v420_v36 }
 0x1e7   : > { %v1254_v37 = vpop.f32.mrb[2].mxu1 }
 0x1e8   : > { %443 = vst.msk [vmem:[%s1675_s27 + $0x18] sm:$0xff] %vm439_vm1, %v1254_v37  ;;  %v430_v38 = vpop.f32.mrb[3].mxu1 }
 0x1e9   : > { %442 = vst.msk [vmem:[%s1675_s27 + $0x10] sm:$0xff] %vm439_vm1, %v430_v38 }
 0x1eb   : > { %v1271_v39 = vpop.f32.mrb[4].mxu1 }
 0x1ec   : > { %1152 = vst.msk [vmem:[%s1675_s27 + $0x28] sm:$0xff] %vm439_vm1, %v1271_v39  ;;  %v610_v40 = vpop.f32.mrb[5].mxu1 }
 0x1ed   : > { %1151 = vst.msk [vmem:[%s1675_s27 + $0x20] sm:$0xff] %vm439_vm1, %v610_v40 }
 0x1ef   : > { %v1274_v41 = vpop.f32.mrb[6].mxu1 }
 0x1f0   : > { %1154 = vst.msk [vmem:[%s1675_s27 + $0x38] sm:$0xff] %vm439_vm1, %v1274_v41  ;;  %v620_v42 = vpop.f32.mrb[7].mxu1 }
 0x1f1   : > { %1153 = vst.msk [vmem:[%s1675_s27 + $0x30] sm:$0xff] %vm439_vm1, %v620_v42 }
 0x1f3   : > { %v1291_v43 = vpop.f32.mrb[8].mxu1 }
 0x1f4   : > { %1166 = vst.msk [vmem:[%s1675_s27 + $0x48] sm:$0xff] %vm439_vm1, %v1291_v43  ;;  %v800_v44 = vpop.f32.mrb[9].mxu1 }
 0x1f5   : > { %1165 = vst.msk [vmem:[%s1675_s27 + $0x40] sm:$0xff] %vm439_vm1, %v800_v44 }
 0x1f7   : > { %v1294_v45 = vpop.f32.mrb[10].mxu1 }
 0x1f8   : > { %1168 = vst.msk [vmem:[%s1675_s27 + $0x58] sm:$0xff] %vm439_vm1, %v1294_v45  ;;  %v810_v46 = vpop.f32.mrb[11].mxu1 }
 0x1f9   : > { %1167 = vst.msk [vmem:[%s1675_s27 + $0x50] sm:$0xff] %vm439_vm1, %v810_v46 }
 0x1fb   : > { %v1311_v47 = vpop.f32.mrb[12].mxu1 }
 0x1fc   : > { %1180 = vst.msk [vmem:[%s1675_s27 + $0x68] sm:$0xff] %vm439_vm1, %v1311_v47  ;;  %v990_v48 = vpop.f32.mrb[13].mxu1 }
 0x1fd   : > { %1179 = vst.msk [vmem:[%s1675_s27 + $0x60] sm:$0xff] %vm439_vm1, %v990_v48 }
 0x1ff   : > { %v1314_v49 = vpop.f32.mrb[14].mxu1 }
 0x200   : > { %1182 = vst.msk [vmem:[%s1675_s27 + $0x78] sm:$0xff] %vm439_vm1, %v1314_v49  ;;  %v1000_v50 = vpop.f32.mrb[15].mxu1 }
 0x201   : > { %1181 = vst.msk [vmem:[%s1675_s27 + $0x70] sm:$0xff] %vm439_vm1, %v1000_v50 }
 0x202 PF: > { %s16_s17 = sadd.s32 1, %s1484_s17   ;;  %s1734_s12 = smov %s1468_s13 }
 0x203   : > { %p13_p9 = scmp.ge.s32.totalorder %s16_s17, 4   ;;  %s1735_s13 = smov %s1472_s14 }
 0x204   : > { %s1736_s14 = smov %s1558_s24  ;;  %s1737_s15 = smov %s1480_s16 }
 0x205   : > { %s1738_s16 = smov %s1740_s19  ;;  %15 = sbr.rel (!%p13_p9) target bundleno = 4 (0x4), region = 81 }
 0x20c   :  { %1044 = vsyncpa [#allocation3], 1 }
 0x20d   :  { %1046 = vsyncpa [#allocation3 + $0x1], 1 }

</bundles_post_ra>
